<compile_context>
chip_gen: v5e
topology: v5e:2x2
jax: 0.10.0
libtpu: 0.0.40
codegen_flags: <defaults>
</compile_context>

<pallas_src>
import functools

import jax
import jax.numpy as jnp
from jax.experimental import pallas as pl
from jax.experimental.pallas import tpu as pltpu


def _round_up(x, m):
    return ((x + m - 1) // m) * m


def swin_head_kernel(x_ref, w_ref, b_ref, o_ref, acc_ref, *, inv_s):
    # x_ref: (tile_n, tile_s, C)  streaming channels-last input tile
    # w_ref: (C, num_classes)     resident classifier weight (pre-transposed)
    # b_ref: (1, num_classes)     resident bias
    # o_ref: (tile_n, num_classes) output logits block
    # acc_ref: (tile_n, C) f32    running spatial sum (persists across S steps)
    s_idx = pl.program_id(1)

    @pl.when(s_idx == 0)
    def _():
        acc_ref[...] = jnp.zeros_like(acc_ref)

    # Steady state: accumulate partial sums over the S (sublane) axis in f32.
    # Works for f32 or bf16 inputs (bf16 halves the HBM stream).
    acc_ref[...] += jnp.sum(x_ref[...].astype(jnp.float32), axis=1)

    @pl.when(s_idx == pl.num_programs(1) - 1)
    def _():
        pooled = acc_ref[...] * inv_s                       # mean over the TRUE S
        # Dropout (eval) == identity.
        logits = jnp.dot(pooled, w_ref[...].astype(jnp.float32),
                         preferred_element_type=jnp.float32)
        logits = logits + b_ref[...].astype(jnp.float32)
        o_ref[...] = logits.astype(o_ref.dtype)


def swin_head_forward(x, weight, bias, *, max_tile_bytes=4 * 1024 * 1024):
    """SwinHead forward.  x: (N, C, T, H, W); weight: (num_classes, C); bias: (num_classes,)."""
    n, c, t, h, w = x.shape
    num_classes = weight.shape[0]
    s = t * h * w

    # Channels-last: C -> lane axis, S -> tiled reduction axis.
    x_nsc = jnp.transpose(x, (0, 2, 3, 4, 1)).reshape(n, s, c)

    # --- tile sizing: keep (x tile) x 2 double buffers well under scoped VMEM ---
    tile_n = min(n, 8)
    n_pad = _round_up(n, tile_n)
    itemsize = jnp.dtype(x_nsc.dtype).itemsize
    bytes_per_s_row = tile_n * c * itemsize
    tile_s = max(8, min(_round_up(s, 8),
                        (max_tile_bytes // max(bytes_per_s_row, 1)) // 8 * 8))
    s_pad = _round_up(s, tile_s)

    # Zero-pad ragged edges: zeros don't change the running sum; divisor is true S.
    if (s_pad != s) or (n_pad != n):
        x_nsc = jnp.pad(x_nsc, ((0, n_pad - n), (0, s_pad - s), (0, 0)))

    w_t = weight.T.astype(jnp.float32)                    # (C, num_classes)
    b2 = bias.reshape(1, num_classes).astype(jnp.float32)

    grid = (n_pad // tile_n, s_pad // tile_s)
    kernel = functools.partial(swin_head_kernel, inv_s=1.0 / float(s))

    out = pl.pallas_call(
        kernel,
        out_shape=jax.ShapeDtypeStruct((n_pad, num_classes), jnp.float32),
        grid_spec=pltpu.PrefetchScalarGridSpec(
            num_scalar_prefetch=0,
            grid=grid,
            in_specs=[
                # streaming x tiles, pipelined over (N, S)
                pl.BlockSpec((tile_n, tile_s, c), lambda i, si: (i, si, 0)),
                # weight & bias: constant index maps -> DMA'd once, stay resident
                pl.BlockSpec((c, num_classes), lambda i, si: (0, 0)),
                pl.BlockSpec((1, num_classes), lambda i, si: (0, 0)),
            ],
            out_specs=pl.BlockSpec((tile_n, num_classes), lambda i, si: (i, 0)),
            scratch_shapes=[pltpu.VMEM((tile_n, c), jnp.float32)],
        ),
        compiler_params=pltpu.CompilerParams(
            dimension_semantics=("parallel", "arbitrary"),  # N across cores, S reduction
        ),
        cost_estimate=pl.CostEstimate(
            flops=n_pad * s_pad * c + 2 * n_pad * c * num_classes,
            transcendentals=0,
            bytes_accessed=(n_pad * s_pad * c * itemsize
                            + c * num_classes * 4
                            + n_pad * num_classes * 4),
        ),
    )(x_nsc, w_t, b2)
    return out[:n]


def reference_forward(x, weight, bias):
    n, c = x.shape[0], x.shape[1]
    pooled = jnp.mean(x.reshape(n, c, -1), axis=-1)
    return pooled @ weight.T + bias


if __name__ == "__main__":
    key = jax.random.PRNGKey(0)
    k_x, k_w, _ = jax.random.split(key, 3)

    # Small shapes consistent with SwinHead: in_channels=32, num_classes=8
    N, C, T, H, W = 2, 32, 2, 4, 4
    NUM_CLASSES = 8
    INIT_STD = 0.01

    x = jax.random.normal(k_x, (N, C, T, H, W), dtype=jnp.float32)
    # Deterministic parameter init (mimics init_weights: normal(std=0.01), zero bias)
    weight = INIT_STD * jax.random.normal(k_w, (NUM_CLASSES, C), dtype=jnp.float32)
    bias = jnp.zeros((NUM_CLASSES,), dtype=jnp.float32)

    out = swin_head_forward(x, weight, bias)
    jax.block_until_ready(out)

    ref = reference_forward(x, weight, bias)
    assert out.shape == (N, NUM_CLASSES)
    assert jnp.allclose(out, ref, atol=1e-5, rtol=1e-5)

    print("KERNEL_OK")
</pallas_src>

<mosaic_0001>
module attributes {stable_mosaic.version = 11 : i64} {
  func.func @swin_head_kernel(%arg0: i32, %arg1: i32, %arg2: memref<2x32x32xf32, #tpu.memory_space<vmem>>, %arg3: memref<32x8xf32, #tpu.memory_space<vmem>>, %arg4: memref<1x8xf32, #tpu.memory_space<vmem>>, %arg5: memref<2x8xf32, #tpu.memory_space<vmem>>, %arg6: memref<2x32xf32, #tpu.memory_space<vmem>>) attributes {dimension_semantics = [#tpu.dimension_semantics<parallel>, #tpu.dimension_semantics<arbitrary>], iteration_bounds = array<i64: 1, 1>, scalar_prefetch = 0 : i64, scratch_operands = 1 : i64, tpu.core_type = #tpu.core_type<tc>, window_params = [{transform_indices = @transform_0, window_bounds = array<i64: 2, 32, 32>}, {pipeline_mode = #tpu.pipeline_mode<synchronous>, transform_indices = @transform_1, window_bounds = array<i64: 32, 8>}, {pipeline_mode = #tpu.pipeline_mode<synchronous>, transform_indices = @transform_2, window_bounds = array<i64: 1, 8>}, {transform_indices = @transform_3, window_bounds = array<i64: 2, 8>}]} {
    %c0_i32 = arith.constant 0 : i32
    %0 = arith.cmpi eq, %arg1, %c0_i32 : i32
    %1 = arith.extui %0 : i1 to i32
    %c0_i32_0 = arith.constant 0 : i32
    %2 = arith.cmpi ne, %1, %c0_i32_0 : i32
    scf.if %2 {
      %cst_9 = arith.constant 0.000000e+00 : f32
      %11 = vector.broadcast %cst_9 : f32 to vector<2x32xf32>
      %c0_10 = arith.constant 0 : index
      %c0_11 = arith.constant 0 : index
      %12 = vector.load %arg6[%c0_10, %c0_11] : memref<2x32xf32, #tpu.memory_space<vmem>>, vector<2x32xf32>
      tpu.vector_store %arg6[%c0_10, %c0_11], %11 {strides = array<i32>} : memref<2x32xf32, #tpu.memory_space<vmem>>, vector<2x32xf32>,
    } else {
    }
    %c0 = arith.constant 0 : index
    %c0_1 = arith.constant 0 : index
    %3 = vector.load %arg6[%c0, %c0_1] : memref<2x32xf32, #tpu.memory_space<vmem>>, vector<2x32xf32>
    %c0_2 = arith.constant 0 : index
    %c0_3 = arith.constant 0 : index
    %c0_4 = arith.constant 0 : index
    %4 = vector.load %arg2[%c0_2, %c0_3, %c0_4] : memref<2x32x32xf32, #tpu.memory_space<vmem>>, vector<2x32x32xf32>
    %cst = arith.constant dense<0.000000e+00> : vector<2x32xf32>
    %5 = vector.multi_reduction <add>, %4, %cst [1] : vector<2x32x32xf32> to vector<2x32xf32>
    %6 = arith.addf %3, %5 : vector<2x32xf32>
    %c0_5 = arith.constant 0 : index
    %c0_6 = arith.constant 0 : index
    %7 = vector.load %arg6[%c0_5, %c0_6] : memref<2x32xf32, #tpu.memory_space<vmem>>, vector<2x32xf32>
    tpu.vector_store %arg6[%c0_5, %c0_6], %6 {strides = array<i32>} : memref<2x32xf32, #tpu.memory_space<vmem>>, vector<2x32xf32>,
    %c0_i32_7 = arith.constant 0 : i32
    %8 = arith.cmpi eq, %arg1, %c0_i32_7 : i32
    %9 = arith.extui %8 : i1 to i32
    %c0_i32_8 = arith.constant 0 : i32
    %10 = arith.cmpi ne, %9, %c0_i32_8 : i32
    scf.if %10 {
      %c0_9 = arith.constant 0 : index
      %c0_10 = arith.constant 0 : index
      %11 = vector.load %arg6[%c0_9, %c0_10] : memref<2x32xf32, #tpu.memory_space<vmem>>, vector<2x32xf32>
      %cst_11 = arith.constant 3.125000e-02 : f32
      %12 = vector.broadcast %cst_11 : f32 to vector<2x32xf32>
      %13 = arith.mulf %11, %12 : vector<2x32xf32>
      %c0_12 = arith.constant 0 : index
      %c0_13 = arith.constant 0 : index
      %14 = vector.load %arg3[%c0_12, %c0_13] : memref<32x8xf32, #tpu.memory_space<vmem>>, vector<32x8xf32>
      %cst_14 = arith.constant dense<0.000000e+00> : vector<2x8xf32>
      %15 = tpu.matmul %13, %14, %cst_14 {dimension_numbers = #tpu.dot_dimension_numbers<[1], [0], [0], [1], [0, 0, 1, 1], [], []>} : vector<2x32xf32>, vector<32x8xf32>, vector<2x8xf32> -> vector<2x8xf32>
      %c0_15 = arith.constant 0 : index
      %c0_16 = arith.constant 0 : index
      %16 = vector.load %arg4[%c0_15, %c0_16] : memref<1x8xf32, #tpu.memory_space<vmem>>, vector<1x8xf32>
      %17 = vector.broadcast %16 : vector<1x8xf32> to vector<2x8xf32>
      %18 = arith.addf %15, %17 : vector<2x8xf32>
      %c0_17 = arith.constant 0 : index
      %c0_18 = arith.constant 0 : index
      %19 = vector.load %arg5[%c0_17, %c0_18] : memref<2x8xf32, #tpu.memory_space<vmem>>, vector<2x8xf32>
      tpu.vector_store %arg5[%c0_17, %c0_18], %18 {strides = array<i32>} : memref<2x8xf32, #tpu.memory_space<vmem>>, vector<2x8xf32>,
    } else {
    }
    return
  }
  func.func @transform_0(%arg0: i32, %arg1: i32) -> (i32, i32, i32) {
    %c0_i32 = arith.constant 0 : i32
    %c0_i32_0 = arith.constant 0 : i32
    return %arg0, %arg1, %c0_i32 : i32, i32, i32
  }
  func.func @transform_1(%arg0: i32, %arg1: i32) -> (i32, i32) {
    %c0_i32 = arith.constant 0 : i32
    %c0_i32_0 = arith.constant 0 : i32
    %c0_i32_1 = arith.constant 0 : i32
    return %c0_i32, %c0_i32_0 : i32, i32
  }
  func.func @transform_2(%arg0: i32, %arg1: i32) -> (i32, i32) {
    %c0_i32 = arith.constant 0 : i32
    %c0_i32_0 = arith.constant 0 : i32
    %c0_i32_1 = arith.constant 0 : i32
    return %c0_i32, %c0_i32_0 : i32, i32
  }
  func.func @transform_3(%arg0: i32, %arg1: i32) -> (i32, i32) {
    %c0_i32 = arith.constant 0 : i32
    %c0_i32_0 = arith.constant 0 : i32
    return %arg0, %c0_i32 : i32, i32
  }
}

</mosaic_0001>

<bundles_post_ra>
// kernel: tpu_custom_call.1
= control target key start
LH: loop header
LB: loop body
LE: loop exit
PB: predicated region body
PF: predicated region fallthrough
CT: control target
= control target key end

     0   :  { %8 = vsyncpa [#allocation4], 0  ;;  %s252_s0 = inlined_call_operand.hbm [shape: f32[2,32,32], index: 0, kind: input, shape index: {}]   ;;  %s253_s1 = inlined_call_operand.vmem [shape: f32[32,8], index: 1, kind: input, shape index: {}]   ;;  %s254_s2 = inlined_call_operand.vmem [shape: f32[1,8], index: 2, kind: input, shape index: {}]   ;;  %s255_s3 = inlined_call_operand.hbm [shape: f32[2,8], index: 3, kind: output, shape index: {}]  }
   0x1   :  { %9 = vsyncpa [#allocation5], 0  ;;  %s14_s14 = sshll.u32 %s252_s0, 4  ;;  %s195_s15 = smov [#allocation3]   ;;  %s15_s14 = int_to_ptr.hbm [resolvable:$true] %s14_s14 }
   0x2   :  { %s16_s16 = sshll.u32 %s195_s15, 4  ;;  %s196_s17 = smov 128   ;;  %s17_s16 = int_to_ptr.vmem [resolvable:$true] %s16_s16 }
   0x3   :  { %s197_s18 = smov 8  }
   0x4   :  { %22 = dma.hbm_to_vmem [thread:$0]  %s15_s14, 1024, %s17_s16, [#allocation4], %s196_s17, %s196_s17, %s197_s18  }
   0x5   :  { %191 = dma.done.wait [#allocation4], 1024  }
   0x6   :  { %192 = vsyncadd [#allocation4], 4294966272  ;;  %vm35_vm0 = vcmask 254976   ;;  %v198_v0 = vmov 0.0   ;;  %vm46_vm1 = vcmask 261120   ;;  %v89_v1 = vld [vmem:[%s253_s1 + $0x18] sm:$0xff] }
   0x7   :  { %36 = vst.msk [vmem:[#allocation2] sm:$0x3] %vm35_vm0, %v198_v0  ;;  %v88_v2 = vld [vmem:[%s253_s1 + $0x10] sm:$0xff]  ;;  %109 = vmatpush.msra.mxu0 %v89_v1  ;;  %v87_v3 = vld [vmem:[%s253_s1 + $0x8] sm:$0xff]  ;;  %v86_v5 = vld [vmem:[%s253_s1] sm:$0xff]  ;;  %vm75_vm2 = vcmask 1041409  }
   0x8   :  { %v38_v4 = vld [vmem:[#allocation3] sm:$0xff]  ;;  %v39_v6 = vld [vmem:[#allocation3 + $0x8] sm:$0xff]  ;;  %v40_v7 = vld [vmem:[#allocation3 + $0x10] sm:$0xff]  ;;  %s199_s27 = smov [#allocation6]   ;;  %s126_s4 = sshll.u32 %s255_s3, 4  ;;  %vm117_vm3 = vcmask 58368   ;;  %s127_s4 = int_to_ptr.hbm [resolvable:$true] %s126_s4 }
   0x9   :  { %v41_v8 = vld [vmem:[#allocation3 + $0x18] sm:$0xff]  ;;  %v47_v9 = vsel %vm46_vm1, %v38_v4, 0.0  ;;  %110 = vmatpush.msra.mxu0 %v88_v2  ;;  %v42_v10 = vld [vmem:[#allocation3 + $0x20] sm:$0xff]  ;;  %v43_v11 = vld [vmem:[#allocation3 + $0x28] sm:$0xff]  ;;  %v48_v13 = vsel %vm46_vm1, %v39_v6, 0.0  ;;  %v50_v14 = vsel %vm46_vm1, %v40_v7, 0.0 }
   0xa   :  { %v44_v12 = vld [vmem:[#allocation3 + $0x30] sm:$0xff]  ;;  %v45_v15 = vld [vmem:[#allocation3 + $0x38] sm:$0xff]  ;;  %v49_v16 = vadd.f32 %v48_v13, %v47_v9  ;;  %v60_v17 = vsel %vm46_vm1, %v42_v10, 0.0  ;;  %v61_v18 = vsel %vm46_vm1, %v43_v11, 0.0  ;;  %v52_v20 = vsel %vm46_vm1, %v41_v8, 0.0  ;;  %s124_s28 = sshll.u32 %s199_s27, 4  ;;  %s125_s28 = int_to_ptr.vmem [resolvable:$true] %s124_s28 }
   0xb   :  { %v63_v19 = vsel %vm46_vm1, %v44_v12, 0.0  ;;  %111 = vmatpush.msra.mxu0 %v87_v3  ;;  %v62_v21 = vadd.f32 %v61_v18, %v60_v17  ;;  %v65_v23 = vsel %vm46_vm1, %v45_v15, 0.0  ;;  %v142_v44 = vld [vmem:[%s254_s2] ss:$0 sm:$0xff] }
   0xc   :  { %v51_v22 = vadd.f32 %v50_v14, %v49_v16 }
   0xd   :  { %112 = vmatpush.msra.mxu0 %v86_v5  ;;  %v64_v24 = vadd.f32 %v63_v19, %v62_v21 }
   0xe   :  { %v53_v25 = vadd.f32 %v52_v20, %v51_v22  ;;  %v37_v38 = vld [vmem:[#allocation2] sm:$0x3] }
   0xf   :  { %v66_v26 = vadd.f32 %v65_v23, %v64_v24 }
  0x10   :  { %v54_v27 = vrot.slane %v53_v25, 4 }
  0x11   :  { %v67_v28 = vrot.slane %v66_v26, 4 }
  0x12   :  { %v55_v29 = vadd.f32 %v54_v27, %v53_v25 }
  0x13   :  { %v68_v30 = vadd.f32 %v67_v28, %v66_v26 }
  0x14   :  { %v56_v31 = vrot.slane %v55_v29, 2 }
  0x15   :  { %v69_v32 = vrot.slane %v68_v30, 2 }
  0x16   :  { %v57_v33 = vadd.f32 %v56_v31, %v55_v29 }
  0x17   :  { %v70_v34 = vadd.f32 %v69_v32, %v68_v30 }
  0x18   :  { %v58_v35 = vrot.slane %v57_v33, 1 }
  0x19   :  { %v71_v36 = vrot.slane %v70_v34, 1 }
  0x1a   :  { %v59_v37 = vadd.f32 %v58_v35, %v57_v33 }
  0x1b   :  { %v72_v39 = vadd.f32 %v71_v36, %v70_v34 }
  0x1d   :  { %v76_v40 = vsel %vm75_vm2, %v72_v39, %v59_v37 }
  0x1e   :  { %v78_v41 = vadd.f32 %v76_v40, %v37_v38 }
  0x20   :  { %80 = vst.msk [vmem:[#allocation2] sm:$0x3] %vm35_vm0, %v78_v41 }
  0x27   :  { %v84_v42 = vld [vmem:[#allocation2] sm:$0x3] }
  0x28   :  { %v85_v43 = vmul.f32 0.03125, %v84_v42 }
  0x2a   :  { %136 = vmatmul.msk.f32.vlgmr.msra.gmra.mxu0 %vm46_vm1, %v85_v43 }
  0xa7   :  { %v114_v45 = vpop.f32.mrf.mxu0 }
  0xa8   :  { %v115_v46 = vadd.f32 %v142_v44, %v114_v45 }
  0xaa   :  { %118 = vst.msk [vmem:[#allocation6] sm:$0x3] %vm117_vm3, %v115_v46 }
  0xab   :  { %129 = dma.vmem_to_hbm [thread:$0]  %s125_s28, 32, %s127_s4, [#allocation5]  }
  0xac   :  { %193 = dma.done.wait [#allocation5], 32  }
  0xad   :  { %194 = vsyncadd [#allocation5], 4294967264 }
  0xae   :  { %134 = vsyncpa [#allocation4], 1 }
  0xaf   :  { %135 = vsyncpa [#allocation5], 1 }

</bundles_post_ra>
